<compile_context>
chip_gen: v7x
topology: tpu7x:2x2x1
jax: 0.10.0
libtpu: 0.0.40
codegen_flags: <defaults>
</compile_context>

<pallas_src>
import numpy as np

import jax
import jax.numpy as jnp
from jax import lax
from jax.experimental import pallas as pl
from jax.experimental.pallas import tpu as pltpu

RRELU_SLOPE = (1.0 / 8.0 + 1.0 / 3.0) / 2.0   # nn.RReLU eval-mode slope
BN_EPS = 1e-5
KSIZE = 7
PAD = 3
STRIDE = 2


def _round_up(x, m):
    return (x + m - 1) // m * m


# ------------------------------ Pallas kernel --------------------------------
def _make_fused_branch_kernel(cin_p, cmid_p, pout, qout, use_xlu_roll):
    """Fused two-layer ConvNormRelu branch.

    Layer 1: 7-tap / stride-2 / pad-3 conv along the MAJOR spatial axis P,
    from input slabs pre-split by (padded-P parity) x (Q parity).  Layer 2:
    7-tap / stride-2 / pad-3 conv along the MINOR spatial axis Q, taken from
    the VMEM-resident layer-1 activation via static lane shifts + masks.
    Folded-BatchNorm shift + eval-mode RReLU after each matmul.

    Per-batch refs:
      see/seo/soe/soo : (cin_p, (pout+3)*qh) bf16   parity-split input slabs
                        s_{Pparity,Qparity}[c, a*qh + b] = xpad[c, 2a(+1), 2b(+1)]
      w1_ref : (cmid_p, 7*cin_p) bf16   conv1 weights, BN scale folded,
                                        columns ordered (tap, cin)
      b1_ref : (cmid_p, 1) f32          conv1 folded BN shift
      w2_ref : (cout,  7*cmid_p) bf16   conv2 weights, BN scale folded
      b2_ref : (cout, 1) f32            conv2 folded BN shift
      o_ref  : (cout, pout*qout)        output slab (spatial rides the lanes)
      rhs1_ref : (7*cin_p, 2*pout*qh) bf16  layer-1 im2col scratch
      rhs2_ref : (7*cmid_p, pout*qout) bf16 layer-2 im2col scratch
    """
    qh = qout                      # Q/2 == Qout for k=7, s=2, p=3, Q even
    m1h = pout * qh                # columns per Q-parity plane
    m1 = 2 * m1h                   # layer-1 matmul M (even half | odd half)
    m2 = pout * qout               # layer-2 matmul M

    def shift_cols(x, d):
        """out[:, i] = x[:, i + d] (per-p-block invalids are masked later)."""
        if d == 0:
            return x
        if use_xlu_roll:
            # cross-lane shift rides the otherwise-idle XLU slot (review);
            # wrapped lanes are zeroed by the per-block mask below.
            return pltpu.roll(x, shift=(-d) % m2, axis=1)
        # lane count not a multiple of 128 (toy sizes): slice+concat always
        # lowers cleanly; vacated lanes are zero-filled (and masked anyway).
        rows = x.shape[0]
        if d > 0:
            return jnp.concatenate(
                [x[:, d:], jnp.zeros((rows, d), x.dtype)], axis=1)
        return jnp.concatenate(
            [jnp.zeros((rows, -d), x.dtype), x[:, :d]], axis=1)

    def kernel(see_ref, seo_ref, soe_ref, soo_ref,
               w1_ref, b1_ref, w2_ref, b2_ref,
               o_ref, rhs1_ref, rhs2_ref):
        # ---------------- layer 1: im2col from parity-split slabs ------------
        # tap kh needs xpad[c, 2p+kh, q]; P parity of (2p+kh) == parity of kh,
        # so each tap is ONE contiguous lane slice per Q-parity source slab.
        # Row blocks are cin_p(=multiple of 8)-aligned (review: padded K).
        # NOTE: at production sizes Q is a multiple of 128, so the (kh//2)*qh
        # lane offsets below are 128-aligned; at toy sizes they are not.
        for kh in range(KSIZE):
            m = kh // 2
            src_e = see_ref if kh % 2 == 0 else soe_ref   # even-q columns
            src_o = seo_ref if kh % 2 == 0 else soo_ref   # odd-q  columns
            r0 = kh * cin_p
            rhs1_ref[r0:r0 + cin_p, 0:m1h] = src_e[:, m * qh:m * qh + m1h]
            rhs1_ref[r0:r0 + cin_p, m1h:m1] = src_o[:, m * qh:m * qh + m1h]

        # Single MXU matmul for all 7 taps: (cmid_p, 7*cin_p) x (7*cin_p, m1).
        acc1 = jnp.dot(w1_ref[...], rhs1_ref[...],
                       preferred_element_type=jnp.float32)
        y1 = acc1 + b1_ref[...]                         # folded BN shift
        y1 = jnp.where(y1 >= 0, y1, y1 * RRELU_SLOPE)   # RReLU (eval mode)
        # Layer-1 activation stays in registers/VMEM (f32), already split by
        # Q parity because of the column ordering chosen above.
        plane_e = y1[:, 0:m1h]     # Y1[:, p, 2b]   flattened (p-major, b-minor)
        plane_o = y1[:, m1h:m1]    # Y1[:, p, 2b+1]

        # ---------------- layer 2: in-VMEM im2col via lane shifts -------------
        # tap kw needs Y1pad[c, p, 2*qo + kw - 3]:
        #   kw odd  -> even-q plane at b = qo + (kw-3)//2
        #   kw even -> odd-q  plane at b = qo + (kw-4)//2
        # Since Qout == Q/2, the plane lane index is just col + d (uniform
        # shift); positions with b outside [0, Qout) are the q-padding and are
        # zeroed with a per-p-block mask.
        qo_idx = lax.broadcasted_iota(jnp.int32, (1, m2), 1) % qout
        for kw in range(KSIZE):
            if kw % 2 == 0:
                plane, d = plane_o, (kw - 4) // 2
            else:
                plane, d = plane_e, (kw - 3) // 2
            v = shift_cols(plane, d)
            if d != 0:
                valid = (qo_idx >= -d) & (qo_idx < qout - d)
                v = jnp.where(valid, v, 0.0)
            r0 = kw * cmid_p
            rhs2_ref[r0:r0 + cmid_p, :] = v.astype(jnp.bfloat16)

        acc2 = jnp.dot(w2_ref[...], rhs2_ref[...],
                       preferred_element_type=jnp.float32)
        y2 = acc2 + b2_ref[...]
        y2 = jnp.where(y2 >= 0, y2, y2 * RRELU_SLOPE)
        o_ref[...] = y2.astype(o_ref.dtype)             # lane-dense store

    return kernel


# -------------------------------- wrapper ------------------------------------
def fused_branch_conv(x_br, w1p, b1p, w2p, b2p, *, out_dtype=jnp.float32):
    """One SplitConv branch: ConvNormRelu (k7,s2,p3 along axis 2 of x_br)
    followed by ConvNormRelu (k7,s2,p3 along axis 3), fused in one kernel.

    x_br : (N, Cin, P, Q).  Returns (N, Cout, P//2, Q//2) in `out_dtype`.
    """
    N, Cin, P, Q = x_br.shape
    assert P % 2 == 0 and Q % 2 == 0, "spatial dims must be even (stride 2)"
    pout, qout = P // 2, Q // 2
    qh = qout
    cmid_p, k1 = w1p.shape
    cin_p = k1 // KSIZE
    cout, k2 = w2p.shape
    assert k1 == KSIZE * cin_p and k2 == KSIZE * cmid_p and cin_p >= Cin
    m1h = pout * qh
    m1 = 2 * m1h
    m2 = pout * qout
    L = (pout + PAD) * qh

    # One-time prep of the branch input (read from HBM once regardless):
    # pad channels to cin_p, pad the conv-1 axis by 3, then split by
    # (padded-P parity) x (Q parity) and flatten spatial onto the lane axis.
    # Under jit this is a single gather-style copy feeding the pallas_call.
    xb = x_br.astype(jnp.bfloat16)
    xb = jnp.pad(xb, ((0, 0), (0, cin_p - Cin), (PAD, PAD), (0, 0)))
    s_ee = xb[:, :, 0::2, 0::2].reshape(N, cin_p, -1)
    s_eo = xb[:, :, 0::2, 1::2].reshape(N, cin_p, -1)
    s_oe = xb[:, :, 1::2, 0::2].reshape(N, cin_p, -1)
    s_oo = xb[:, :, 1::2, 1::2].reshape(N, cin_p, -1)
    # Static guards: VMEM reads have no runtime bounds check (review note).
    assert s_ee.shape[-1] == L and s_oo.shape[-1] == L
    assert (KSIZE // 2) * qh + m1h <= L

    flops = int(2 * N * (cmid_p * k1 * m1 + cout * k2 * m2))
    bytes_accessed = int(
        4 * N * cin_p * L * 2                      # parity-split input slabs
        + (cmid_p * k1 + cout * k2) * 2            # bf16 weights
        + (cmid_p + cout) * 4                      # f32 shifts
        + N * cout * m2 * np.dtype(out_dtype).itemsize)   # output

    # NOTE: at production sizes add a spatial (M) tile axis to the grid marked
    # "parallel" in big multiples of 128 lanes (512-2048) and re-derive the
    # tile for v7x's 64 MiB VMEM (the 7x im2col scratch dominates the budget).
    out = pl.pallas_call(
        _make_fused_branch_kernel(cin_p, cmid_p, pout, qout,
                                  use_xlu_roll=(m2 % 128 == 0)),
        out_shape=jax.ShapeDtypeStruct((N, cout, m2), out_dtype),
        grid=(N,),
        in_specs=[
            pl.BlockSpec((None, cin_p, L), lambda n: (n, 0, 0)),
            pl.BlockSpec((None, cin_p, L), lambda n: (n, 0, 0)),
            pl.BlockSpec((None, cin_p, L), lambda n: (n, 0, 0)),
            pl.BlockSpec((None, cin_p, L), lambda n: (n, 0, 0)),
            pl.BlockSpec((cmid_p, k1), lambda n: (0, 0)),
            pl.BlockSpec((cmid_p, 1), lambda n: (0, 0)),
            pl.BlockSpec((cout, k2), lambda n: (0, 0)),
            pl.BlockSpec((cout, 1), lambda n: (0, 0)),
        ],
        out_specs=pl.BlockSpec((None, cout, m2), lambda n: (n, 0, 0)),
        scratch_shapes=[pltpu.VMEM((k1, m1), jnp.bfloat16),    # layer-1 im2col
                        pltpu.VMEM((k2, m2), jnp.bfloat16)],   # layer-2 im2col
        compiler_params=pltpu.CompilerParams(
            dimension_semantics=("parallel",),      # v7x: 2 TensorCores
            vmem_limit_bytes=32 * 1024 * 1024),
        cost_estimate=pl.CostEstimate(flops=flops, transcendentals=0,
                                      bytes_accessed=bytes_accessed),
    )(s_ee, s_eo, s_oe, s_oo, w1p, b1p, w2p, b2p)
    return out.reshape(N, cout, pout, qout)


# ------------------------------- SplitConv -----------------------------------
def split_conv_forward(x_nchw, kparams):
    """SplitConv forward.  x_nchw: (N, Cin, H, W) f32.  Returns NCHW f32."""
    params_a, params_b = kparams

    # branch a: (7,1) s(2,1) conv along H, then (1,7) s(1,2) along W — one
    # fused kernel, input in its natural (H-major, W-minor) layout.
    a = fused_branch_conv(x_nchw, *params_a)            # (N, C2, Ho, Wo)

    # branch b: (1,7) s(1,2) conv along W first, then (7,1) s(2,1) along H —
    # same fused kernel with the W-major transposed input; its output comes
    # back (Wo-major, Ho-minor) and is transposed once (small f32 tensor).
    xt = jnp.transpose(x_nchw, (0, 1, 3, 2))
    b = fused_branch_conv(xt, *params_b)                # (N, C2, Wo, Ho)
    b = jnp.transpose(b, (0, 1, 3, 2))                  # (N, C2, Ho, Wo)

    # TODO(synk): a mirrored kernel variant (layer 1 along the minor axis)
    # would let branch b run untransposed and both branches write
    # channel-offset blocks of one preallocated output, removing this
    # transpose and the concatenate.
    return jnp.concatenate([a, b], axis=1)              # (N, 2*C2, Ho, Wo)


# --------------------- parameter setup (deterministic) -----------------------
def init_layer(key, cin, cout, kshape):
    kw, kg, kb, km, kv = jax.random.split(key, 5)
    w = 0.1 * jax.random.normal(kw, (cout, cin) + kshape, jnp.float32)  # OIHW
    gamma = jax.random.uniform(kg, (cout,), jnp.float32, 0.5, 1.5)
    beta = 0.1 * jax.random.normal(kb, (cout,), jnp.float32)
    mean = 0.1 * jax.random.normal(km, (cout,), jnp.float32)
    var = jax.random.uniform(kv, (cout,), jnp.float32, 0.5, 1.5)
    return w, gamma, beta, mean, var


def fold_bn(gamma, beta, mean, var):
    scale = gamma / jnp.sqrt(var + BN_EPS)
    shift = beta - mean * scale
    return scale, shift


def pack_layer(w_oihw, gamma, beta, mean, var, cin_pad, cout_pad):
    """Fold the BN scale into the conv weights (the conv is linear) and pack
    to (cout_pad, 7*cin_pad) bf16 with columns ordered (tap, cin); padded
    rows/columns are zero so the K/M padding is numerically inert.  The BN
    shift is the only per-channel epilogue term left for the kernel."""
    scale, shift = fold_bn(gamma, beta, mean, var)
    cout, cin = w_oihw.shape[:2]
    w = w_oihw.reshape(cout, cin, KSIZE) * scale[:, None, None]   # (co,ci,7)
    w = jnp.transpose(w, (0, 2, 1))                               # (co,7,ci)
    w = jnp.pad(w, ((0, cout_pad - cout), (0, 0), (0, cin_pad - cin)))
    w = w.reshape(cout_pad, KSIZE * cin_pad).astype(jnp.bfloat16)
    shift = jnp.pad(shift, (0, cout_pad - cout))
    return w, shift.reshape(cout_pad, 1).astype(jnp.float32)


# --------------------------- pure-JAX reference ------------------------------
def _ref_layer(x, w, gamma, beta, mean, var, stride, pad):
    scale, shift = fold_bn(gamma, beta, mean, var)
    y = lax.conv_general_dilated(
        x, w, window_strides=stride, padding=pad,
        dimension_numbers=('NCHW', 'OIHW', 'NCHW'),
        precision=lax.Precision.HIGHEST)
    y = y * scale[None, :, None, None] + shift[None, :, None, None]
    return jnp.where(y >= 0, y, y * RRELU_SLOPE)


def ref_forward(x, raw_params):
    la1, la2, lb1, lb2 = raw_params
    a = _ref_layer(x, *la1, (2, 1), [(3, 3), (0, 0)])
    a = _ref_layer(a, *la2, (1, 2), [(0, 0), (3, 3)])
    b = _ref_layer(x, *lb1, (1, 2), [(0, 0), (3, 3)])
    b = _ref_layer(b, *lb2, (2, 1), [(3, 3), (0, 0)])
    return jnp.concatenate([a, b], axis=1)


if __name__ == "__main__":
    key = jax.random.PRNGKey(0)
    kx, ka1, ka2, kb1, kb2 = jax.random.split(key, 5)

    in_ch, out_ch = 4, 8
    half = out_ch // 2
    x = jax.random.normal(kx, (2, in_ch, 16, 16), jnp.float32)    # NCHW

    raw_a1 = init_layer(ka1, in_ch, half, (7, 1))   # branch a, layer 1
    raw_a2 = init_layer(ka2, half, half, (1, 7))    # branch a, layer 2
    raw_b1 = init_layer(kb1, in_ch, half, (1, 7))   # branch b, layer 1
    raw_b2 = init_layer(kb2, half, half, (7, 1))    # branch b, layer 2

    # K padding (review): per-tap Cin block -> multiple of 8 (HBM-facing);
    # intermediate channels -> multiple of 16 (VMEM-only, free) so the
    # layer-2 im2col row blocks are full bf16 sublane tiles.
    cin_p = _round_up(in_ch, 8)
    cmid_p = _round_up(half, 16)

    params_a = pack_layer(*raw_a1, cin_p, cmid_p) + pack_layer(*raw_a2, cmid_p, half)
    params_b = pack_layer(*raw_b1, cin_p, cmid_p) + pack_layer(*raw_b2, cmid_p, half)
    kparams = (params_a, params_b)

    fwd = jax.jit(split_conv_forward)
    out = jax.block_until_ready(fwd(x, kparams))
    ref = jax.block_until_ready(ref_forward(x, (raw_a1, raw_a2, raw_b1, raw_b2)))

    assert out.shape == (2, out_ch, 8, 8), out.shape
    # bf16 MXU operands across two fused convs vs. an f32 HIGHEST reference.
    np.testing.assert_allclose(np.asarray(out), np.asarray(ref),
                               rtol=5e-2, atol=5e-2)
    print("KERNEL_OK")
</pallas_src>

<mosaic_0001>
module attributes {stable_mosaic.version = 11 : i64} {
  func.func @kernel(%arg0: i32, %arg1: memref<1x8x88xbf16, #tpu.memory_space<vmem>>, %arg2: memref<1x8x88xbf16, #tpu.memory_space<vmem>>, %arg3: memref<1x8x88xbf16, #tpu.memory_space<vmem>>, %arg4: memref<1x8x88xbf16, #tpu.memory_space<vmem>>, %arg5: memref<16x56xbf16, #tpu.memory_space<vmem>>, %arg6: memref<16x1xf32, #tpu.memory_space<vmem>>, %arg7: memref<4x112xbf16, #tpu.memory_space<vmem>>, %arg8: memref<4x1xf32, #tpu.memory_space<vmem>>, %arg9: memref<1x4x64xf32, #tpu.memory_space<vmem>>, %arg10: memref<56x128xbf16, #tpu.memory_space<vmem>>, %arg11: memref<112x64xbf16, #tpu.memory_space<vmem>>) attributes {dimension_semantics = [#tpu.dimension_semantics<parallel>], iteration_bounds = array<i64: 2>, scalar_prefetch = 0 : i64, scratch_operands = 2 : i64, tpu.core_type = #tpu.core_type<tc>, window_params = [{transform_indices = @transform_0, window_bounds = array<i64: 1, 8, 88>}, {transform_indices = @transform_1, window_bounds = array<i64: 1, 8, 88>}, {transform_indices = @transform_2, window_bounds = array<i64: 1, 8, 88>}, {transform_indices = @transform_3, window_bounds = array<i64: 1, 8, 88>}, {pipeline_mode = #tpu.pipeline_mode<synchronous>, transform_indices = @transform_4, window_bounds = array<i64: 16, 56>}, {pipeline_mode = #tpu.pipeline_mode<synchronous>, transform_indices = @transform_5, window_bounds = array<i64: 16, 1>}, {pipeline_mode = #tpu.pipeline_mode<synchronous>, transform_indices = @transform_6, window_bounds = array<i64: 4, 112>}, {pipeline_mode = #tpu.pipeline_mode<synchronous>, transform_indices = @transform_7, window_bounds = array<i64: 4, 1>}, {transform_indices = @transform_8, window_bounds = array<i64: 1, 4, 64>}]} {
    %c0 = arith.constant 0 : index
    %c0_0 = arith.constant 0 : index
    %c0_1 = arith.constant 0 : index
    %0 = vector.load %arg1[%c0, %c0_0, %c0_1] : memref<1x8x88xbf16, #tpu.memory_space<vmem>>, vector<1x8x64xbf16>
    %1 = vector.shape_cast %0 : vector<1x8x64xbf16> to vector<8x64xbf16>
    %c0_2 = arith.constant 0 : index
    %c0_3 = arith.constant 0 : index
    %2 = vector.load %arg10[%c0_2, %c0_3] : memref<56x128xbf16, #tpu.memory_space<vmem>>, vector<8x64xbf16>
    tpu.vector_store %arg10[%c0_2, %c0_3], %1 {strides = array<i32>} : memref<56x128xbf16, #tpu.memory_space<vmem>>, vector<8x64xbf16>,
    %c0_4 = arith.constant 0 : index
    %c0_5 = arith.constant 0 : index
    %c0_6 = arith.constant 0 : index
    %3 = vector.load %arg2[%c0_4, %c0_5, %c0_6] : memref<1x8x88xbf16, #tpu.memory_space<vmem>>, vector<1x8x64xbf16>
    %4 = vector.shape_cast %3 : vector<1x8x64xbf16> to vector<8x64xbf16>
    %c0_7 = arith.constant 0 : index
    %c64 = arith.constant 64 : index
    %5 = vector.load %arg10[%c0_7, %c64] : memref<56x128xbf16, #tpu.memory_space<vmem>>, vector<8x64xbf16>
    tpu.vector_store %arg10[%c0_7, %c64], %4 {strides = array<i32>} : memref<56x128xbf16, #tpu.memory_space<vmem>>, vector<8x64xbf16>,
    %c0_8 = arith.constant 0 : index
    %c0_9 = arith.constant 0 : index
    %c0_10 = arith.constant 0 : index
    %6 = vector.load %arg3[%c0_8, %c0_9, %c0_10] : memref<1x8x88xbf16, #tpu.memory_space<vmem>>, vector<1x8x64xbf16>
    %7 = vector.shape_cast %6 : vector<1x8x64xbf16> to vector<8x64xbf16>
    %c8 = arith.constant 8 : index
    %c0_11 = arith.constant 0 : index
    %8 = vector.load %arg10[%c8, %c0_11] : memref<56x128xbf16, #tpu.memory_space<vmem>>, vector<8x64xbf16>
    tpu.vector_store %arg10[%c8, %c0_11], %7 {strides = array<i32>} : memref<56x128xbf16, #tpu.memory_space<vmem>>, vector<8x64xbf16>,
    %c0_12 = arith.constant 0 : index
    %c0_13 = arith.constant 0 : index
    %c0_14 = arith.constant 0 : index
    %9 = vector.load %arg4[%c0_12, %c0_13, %c0_14] : memref<1x8x88xbf16, #tpu.memory_space<vmem>>, vector<1x8x64xbf16>
    %10 = vector.shape_cast %9 : vector<1x8x64xbf16> to vector<8x64xbf16>
    %c8_15 = arith.constant 8 : index
    %c64_16 = arith.constant 64 : index
    %11 = vector.load %arg10[%c8_15, %c64_16] : memref<56x128xbf16, #tpu.memory_space<vmem>>, vector<8x64xbf16>
    tpu.vector_store %arg10[%c8_15, %c64_16], %10 {strides = array<i32>} : memref<56x128xbf16, #tpu.memory_space<vmem>>, vector<8x64xbf16>,
    %c0_17 = arith.constant 0 : index
    %c0_18 = arith.constant 0 : index
    %c8_19 = arith.constant 8 : index
    %12 = vector.load %arg1[%c0_17, %c0_18, %c8_19] : memref<1x8x88xbf16, #tpu.memory_space<vmem>>, vector<1x8x64xbf16>
    %13 = vector.shape_cast %12 : vector<1x8x64xbf16> to vector<8x64xbf16>
    %c16 = arith.constant 16 : index
    %c0_20 = arith.constant 0 : index
    %14 = vector.load %arg10[%c16, %c0_20] : memref<56x128xbf16, #tpu.memory_space<vmem>>, vector<8x64xbf16>
    tpu.vector_store %arg10[%c16, %c0_20], %13 {strides = array<i32>} : memref<56x128xbf16, #tpu.memory_space<vmem>>, vector<8x64xbf16>,
    %c0_21 = arith.constant 0 : index
    %c0_22 = arith.constant 0 : index
    %c8_23 = arith.constant 8 : index
    %15 = vector.load %arg2[%c0_21, %c0_22, %c8_23] : memref<1x8x88xbf16, #tpu.memory_space<vmem>>, vector<1x8x64xbf16>
    %16 = vector.shape_cast %15 : vector<1x8x64xbf16> to vector<8x64xbf16>
    %c16_24 = arith.constant 16 : index
    %c64_25 = arith.constant 64 : index
    %17 = vector.load %arg10[%c16_24, %c64_25] : memref<56x128xbf16, #tpu.memory_space<vmem>>, vector<8x64xbf16>
    tpu.vector_store %arg10[%c16_24, %c64_25], %16 {strides = array<i32>} : memref<56x128xbf16, #tpu.memory_space<vmem>>, vector<8x64xbf16>,
    %c0_26 = arith.constant 0 : index
    %c0_27 = arith.constant 0 : index
    %c8_28 = arith.constant 8 : index
    %18 = vector.load %arg3[%c0_26, %c0_27, %c8_28] : memref<1x8x88xbf16, #tpu.memory_space<vmem>>, vector<1x8x64xbf16>
    %19 = vector.shape_cast %18 : vector<1x8x64xbf16> to vector<8x64xbf16>
    %c24 = arith.constant 24 : index
    %c0_29 = arith.constant 0 : index
    %20 = vector.load %arg10[%c24, %c0_29] : memref<56x128xbf16, #tpu.memory_space<vmem>>, vector<8x64xbf16>
    tpu.vector_store %arg10[%c24, %c0_29], %19 {strides = array<i32>} : memref<56x128xbf16, #tpu.memory_space<vmem>>, vector<8x64xbf16>,
    %c0_30 = arith.constant 0 : index
    %c0_31 = arith.constant 0 : index
    %c8_32 = arith.constant 8 : index
    %21 = vector.load %arg4[%c0_30, %c0_31, %c8_32] : memref<1x8x88xbf16, #tpu.memory_space<vmem>>, vector<1x8x64xbf16>
    %22 = vector.shape_cast %21 : vector<1x8x64xbf16> to vector<8x64xbf16>
    %c24_33 = arith.constant 24 : index
    %c64_34 = arith.constant 64 : index
    %23 = vector.load %arg10[%c24_33, %c64_34] : memref<56x128xbf16, #tpu.memory_space<vmem>>, vector<8x64xbf16>
    tpu.vector_store %arg10[%c24_33, %c64_34], %22 {strides = array<i32>} : memref<56x128xbf16, #tpu.memory_space<vmem>>, vector<8x64xbf16>,
    %c0_35 = arith.constant 0 : index
    %c0_36 = arith.constant 0 : index
    %c16_37 = arith.constant 16 : index
    %24 = vector.load %arg1[%c0_35, %c0_36, %c16_37] : memref<1x8x88xbf16, #tpu.memory_space<vmem>>, vector<1x8x64xbf16>
    %25 = vector.shape_cast %24 : vector<1x8x64xbf16> to vector<8x64xbf16>
    %c32 = arith.constant 32 : index
    %c0_38 = arith.constant 0 : index
    %26 = vector.load %arg10[%c32, %c0_38] : memref<56x128xbf16, #tpu.memory_space<vmem>>, vector<8x64xbf16>
    tpu.vector_store %arg10[%c32, %c0_38], %25 {strides = array<i32>} : memref<56x128xbf16, #tpu.memory_space<vmem>>, vector<8x64xbf16>,
    %c0_39 = arith.constant 0 : index
    %c0_40 = arith.constant 0 : index
    %c16_41 = arith.constant 16 : index
    %27 = vector.load %arg2[%c0_39, %c0_40, %c16_41] : memref<1x8x88xbf16, #tpu.memory_space<vmem>>, vector<1x8x64xbf16>
    %28 = vector.shape_cast %27 : vector<1x8x64xbf16> to vector<8x64xbf16>
    %c32_42 = arith.constant 32 : index
    %c64_43 = arith.constant 64 : index
    %29 = vector.load %arg10[%c32_42, %c64_43] : memref<56x128xbf16, #tpu.memory_space<vmem>>, vector<8x64xbf16>
    tpu.vector_store %arg10[%c32_42, %c64_43], %28 {strides = array<i32>} : memref<56x128xbf16, #tpu.memory_space<vmem>>, vector<8x64xbf16>,
    %c0_44 = arith.constant 0 : index
    %c0_45 = arith.constant 0 : index
    %c16_46 = arith.constant 16 : index
    %30 = vector.load %arg3[%c0_44, %c0_45, %c16_46] : memref<1x8x88xbf16, #tpu.memory_space<vmem>>, vector<1x8x64xbf16>
    %31 = vector.shape_cast %30 : vector<1x8x64xbf16> to vector<8x64xbf16>
    %c40 = arith.constant 40 : index
    %c0_47 = arith.constant 0 : index
    %32 = vector.load %arg10[%c40, %c0_47] : memref<56x128xbf16, #tpu.memory_space<vmem>>, vector<8x64xbf16>
    tpu.vector_store %arg10[%c40, %c0_47], %31 {strides = array<i32>} : memref<56x128xbf16, #tpu.memory_space<vmem>>, vector<8x64xbf16>,
    %c0_48 = arith.constant 0 : index
    %c0_49 = arith.constant 0 : index
    %c16_50 = arith.constant 16 : index
    %33 = vector.load %arg4[%c0_48, %c0_49, %c16_50] : memref<1x8x88xbf16, #tpu.memory_space<vmem>>, vector<1x8x64xbf16>
    %34 = vector.shape_cast %33 : vector<1x8x64xbf16> to vector<8x64xbf16>
    %c40_51 = arith.constant 40 : index
    %c64_52 = arith.constant 64 : index
    %35 = vector.load %arg10[%c40_51, %c64_52] : memref<56x128xbf16, #tpu.memory_space<vmem>>, vector<8x64xbf16>
    tpu.vector_store %arg10[%c40_51, %c64_52], %34 {strides = array<i32>} : memref<56x128xbf16, #tpu.memory_space<vmem>>, vector<8x64xbf16>,
    %c0_53 = arith.constant 0 : index
    %c0_54 = arith.constant 0 : index
    %c24_55 = arith.constant 24 : index
    %36 = vector.load %arg1[%c0_53, %c0_54, %c24_55] : memref<1x8x88xbf16, #tpu.memory_space<vmem>>, vector<1x8x64xbf16>
    %37 = vector.shape_cast %36 : vector<1x8x64xbf16> to vector<8x64xbf16>
    %c48 = arith.constant 48 : index
    %c0_56 = arith.constant 0 : index
    %38 = vector.load %arg10[%c48, %c0_56] : memref<56x128xbf16, #tpu.memory_space<vmem>>, vector<8x64xbf16>
    tpu.vector_store %arg10[%c48, %c0_56], %37 {strides = array<i32>} : memref<56x128xbf16, #tpu.memory_space<vmem>>, vector<8x64xbf16>,
    %c0_57 = arith.constant 0 : index
    %c0_58 = arith.constant 0 : index
    %c24_59 = arith.constant 24 : index
    %39 = vector.load %arg2[%c0_57, %c0_58, %c24_59] : memref<1x8x88xbf16, #tpu.memory_space<vmem>>, vector<1x8x64xbf16>
    %40 = vector.shape_cast %39 : vector<1x8x64xbf16> to vector<8x64xbf16>
    %c48_60 = arith.constant 48 : index
    %c64_61 = arith.constant 64 : index
    %41 = vector.load %arg10[%c48_60, %c64_61] : memref<56x128xbf16, #tpu.memory_space<vmem>>, vector<8x64xbf16>
    tpu.vector_store %arg10[%c48_60, %c64_61], %40 {strides = array<i32>} : memref<56x128xbf16, #tpu.memory_space<vmem>>, vector<8x64xbf16>,
    %c0_62 = arith.constant 0 : index
    %c0_63 = arith.constant 0 : index
    %42 = vector.load %arg5[%c0_62, %c0_63] : memref<16x56xbf16, #tpu.memory_space<vmem>>, vector<16x56xbf16>
    %c0_64 = arith.constant 0 : index
    %c0_65 = arith.constant 0 : index
    %43 = vector.load %arg10[%c0_64, %c0_65] : memref<56x128xbf16, #tpu.memory_space<vmem>>, vector<56x128xbf16>
    %cst = arith.constant dense<0.000000e+00> : vector<16x128xf32>
    %44 = tpu.matmul %42, %43, %cst {dimension_numbers = #tpu.dot_dimension_numbers<[1], [0], [0], [1], [0, 0, 1, 1], [], []>} : vector<16x56xbf16>, vector<56x128xbf16>, vector<16x128xf32> -> vector<16x128xf32>
    %c0_66 = arith.constant 0 : index
    %c0_67 = arith.constant 0 : index
    %45 = vector.load %arg6[%c0_66, %c0_67] : memref<16x1xf32, #tpu.memory_space<vmem>>, vector<16x1xf32>
    %46 = vector.broadcast %45 : vector<16x1xf32> to vector<16x128xf32>
    %47 = arith.addf %44, %46 : vector<16x128xf32>
    %cst_68 = arith.constant 0.000000e+00 : f32
    %48 = vector.broadcast %cst_68 : f32 to vector<16x128xf32>
    %49 = arith.cmpf oge, %47, %48 : vector<16x128xf32>
    %cst_69 = arith.constant 0.229166672 : f32
    %50 = vector.broadcast %cst_69 : f32 to vector<16x128xf32>
    %51 = arith.mulf %47, %50 : vector<16x128xf32>
    %52 = arith.select %49, %47, %51 : vector<16x128xi1>, vector<16x128xf32>
    %53 = vector.extract_strided_slice %52 {offsets = [0, 0], sizes = [16, 64], strides = [1, 1]} : vector<16x128xf32> to vector<16x64xf32>
    %54 = vector.extract_strided_slice %52 {offsets = [0, 64], sizes = [16, 64], strides = [1, 1]} : vector<16x128xf32> to vector<16x64xf32>
    %55 = tpu.iota {dimensions = array<i32: 1>} : vector<1x64xi32>
    %c8_i32 = arith.constant 8 : i32
    %c0_i32 = arith.constant 0 : i32
    %56 = arith.cmpi eq, %c8_i32, %c0_i32 : i32
    %c1_i32 = arith.constant 1 : i32
    %57 = arith.select %56, %c1_i32, %c8_i32 : i32
    %58 = vector.broadcast %57 : i32 to vector<1x64xi32>
    %59 = arith.remsi %55, %58 : vector<1x64xi32>
    %c0_i32_70 = arith.constant 0 : i32
    %60 = vector.broadcast %c0_i32_70 : i32 to vector<1x64xi32>
    %61 = arith.cmpi ne, %59, %60 : vector<1x64xi32>
    %c0_i32_71 = arith.constant 0 : i32
    %62 = vector.broadcast %c0_i32_71 : i32 to vector<1x64xi32>
    %63 = arith.cmpi slt, %59, %62 : vector<1x64xi32>
    %c0_i32_72 = arith.constant 0 : i32
    %64 = arith.cmpi slt, %57, %c0_i32_72 : i32
    %65 = vector.broadcast %64 : i1 to vector<1x64xi1>
    %66 = vector.broadcast %65 : vector<1x64xi1> to vector<1x64xi1>
    %67 = arith.xori %63, %66 : vector<1x64xi1>
    %68 = arith.andi %67, %61 : vector<1x64xi1>
    %69 = vector.broadcast %57 : i32 to vector<1x64xi32>
    %70 = arith.addi %59, %69 : vector<1x64xi32>
    %71 = arith.select %68, %70, %59 : vector<1x64xi1>, vector<1x64xi32>
    %cst_73 = arith.constant 0.000000e+00 : f32
    %72 = vector.broadcast %cst_73 : f32 to vector<16x2xf32>
    %73 = vector.extract_strided_slice %54 {offsets = [0, 0], sizes = [16, 62], strides = [1, 1]} : vector<16x64xf32> to vector<16x62xf32>
    %74 = tpu.concatenate %72, %73 in 1 : vector<16x2xf32>, vector<16x62xf32> -> vector<16x64xf32>
    %c2_i32 = arith.constant 2 : i32
    %75 = vector.broadcast %c2_i32 : i32 to vector<1x64xi32>
    %76 = arith.cmpi sge, %71, %75 : vector<1x64xi32>
    %c10_i32 = arith.constant 10 : i32
    %77 = vector.broadcast %c10_i32 : i32 to vector<1x64xi32>
    %78 = arith.cmpi slt, %71, %77 : vector<1x64xi32>
    %79 = arith.andi %76, %78 : vector<1x64xi1>
    %cst_74 = arith.constant 0.000000e+00 : f32
    %80 = vector.shape_cast %79 : vector<1x64xi1> to vector<1x64xi1>
    %81 = vector.broadcast %80 : vector<1x64xi1> to vector<16x64xi1>
    %82 = vector.broadcast %cst_74 : f32 to vector<16x64xf32>
    %83 = arith.select %81, %74, %82 : vector<16x64xi1>, vector<16x64xf32>
    %84 = arith.truncf %83 : vector<16x64xf32> to vector<16x64xbf16>
    %c0_75 = arith.constant 0 : index
    %c0_76 = arith.constant 0 : index
    %85 = vector.load %arg11[%c0_75, %c0_76] : memref<112x64xbf16, #tpu.memory_space<vmem>>, vector<16x64xbf16>
    tpu.vector_store %arg11[%c0_75, %c0_76], %84 {strides = array<i32>} : memref<112x64xbf16, #tpu.memory_space<vmem>>, vector<16x64xbf16>,
    %cst_77 = arith.constant 0.000000e+00 : f32
    %86 = vector.broadcast %cst_77 : f32 to vector<16x1xf32>
    %87 = vector.extract_strided_slice %53 {offsets = [0, 0], sizes = [16, 63], strides = [1, 1]} : vector<16x64xf32> to vector<16x63xf32>
    %88 = tpu.concatenate %86, %87 in 1 : vector<16x1xf32>, vector<16x63xf32> -> vector<16x64xf32>
    %c1_i32_78 = arith.constant 1 : i32
    %89 = vector.broadcast %c1_i32_78 : i32 to vector<1x64xi32>
    %90 = arith.cmpi sge, %71, %89 : vector<1x64xi32>
    %c9_i32 = arith.constant 9 : i32
    %91 = vector.broadcast %c9_i32 : i32 to vector<1x64xi32>
    %92 = arith.cmpi slt, %71, %91 : vector<1x64xi32>
    %93 = arith.andi %90, %92 : vector<1x64xi1>
    %cst_79 = arith.constant 0.000000e+00 : f32
    %94 = vector.shape_cast %93 : vector<1x64xi1> to vector<1x64xi1>
    %95 = vector.broadcast %94 : vector<1x64xi1> to vector<16x64xi1>
    %96 = vector.broadcast %cst_79 : f32 to vector<16x64xf32>
    %97 = arith.select %95, %88, %96 : vector<16x64xi1>, vector<16x64xf32>
    %98 = arith.truncf %97 : vector<16x64xf32> to vector<16x64xbf16>
    %c16_80 = arith.constant 16 : index
    %c0_81 = arith.constant 0 : index
    %99 = vector.load %arg11[%c16_80, %c0_81] : memref<112x64xbf16, #tpu.memory_space<vmem>>, vector<16x64xbf16>
    tpu.vector_store %arg11[%c16_80, %c0_81], %98 {strides = array<i32>} : memref<112x64xbf16, #tpu.memory_space<vmem>>, vector<16x64xbf16>,
    %cst_82 = arith.constant 0.000000e+00 : f32
    %100 = vector.broadcast %cst_82 : f32 to vector<16x1xf32>
    %101 = vector.extract_strided_slice %54 {offsets = [0, 0], sizes = [16, 63], strides = [1, 1]} : vector<16x64xf32> to vector<16x63xf32>
    %102 = tpu.concatenate %100, %101 in 1 : vector<16x1xf32>, vector<16x63xf32> -> vector<16x64xf32>
    %c1_i32_83 = arith.constant 1 : i32
    %103 = vector.broadcast %c1_i32_83 : i32 to vector<1x64xi32>
    %104 = arith.cmpi sge, %71, %103 : vector<1x64xi32>
    %c9_i32_84 = arith.constant 9 : i32
    %105 = vector.broadcast %c9_i32_84 : i32 to vector<1x64xi32>
    %106 = arith.cmpi slt, %71, %105 : vector<1x64xi32>
    %107 = arith.andi %104, %106 : vector<1x64xi1>
    %cst_85 = arith.constant 0.000000e+00 : f32
    %108 = vector.shape_cast %107 : vector<1x64xi1> to vector<1x64xi1>
    %109 = vector.broadcast %108 : vector<1x64xi1> to vector<16x64xi1>
    %110 = vector.broadcast %cst_85 : f32 to vector<16x64xf32>
    %111 = arith.select %109, %102, %110 : vector<16x64xi1>, vector<16x64xf32>
    %112 = arith.truncf %111 : vector<16x64xf32> to vector<16x64xbf16>
    %c32_86 = arith.constant 32 : index
    %c0_87 = arith.constant 0 : index
    %113 = vector.load %arg11[%c32_86, %c0_87] : memref<112x64xbf16, #tpu.memory_space<vmem>>, vector<16x64xbf16>
    tpu.vector_store %arg11[%c32_86, %c0_87], %112 {strides = array<i32>} : memref<112x64xbf16, #tpu.memory_space<vmem>>, vector<16x64xbf16>,
    %114 = arith.truncf %53 : vector<16x64xf32> to vector<16x64xbf16>
    %c48_88 = arith.constant 48 : index
    %c0_89 = arith.constant 0 : index
    %115 = vector.load %arg11[%c48_88, %c0_89] : memref<112x64xbf16, #tpu.memory_space<vmem>>, vector<16x64xbf16>
    tpu.vector_store %arg11[%c48_88, %c0_89], %114 {strides = array<i32>} : memref<112x64xbf16, #tpu.memory_space<vmem>>, vector<16x64xbf16>,
    %116 = arith.truncf %54 : vector<16x64xf32> to vector<16x64xbf16>
    %c64_90 = arith.constant 64 : index
    %c0_91 = arith.constant 0 : index
    %117 = vector.load %arg11[%c64_90, %c0_91] : memref<112x64xbf16, #tpu.memory_space<vmem>>, vector<16x64xbf16>
    tpu.vector_store %arg11[%c64_90, %c0_91], %116 {strides = array<i32>} : memref<112x64xbf16, #tpu.memory_space<vmem>>, vector<16x64xbf16>,
    %118 = vector.extract_strided_slice %53 {offsets = [0, 1], sizes = [16, 63], strides = [1, 1]} : vector<16x64xf32> to vector<16x63xf32>
    %cst_92 = arith.constant 0.000000e+00 : f32
    %119 = vector.broadcast %cst_92 : f32 to vector<16x1xf32>
    %120 = tpu.concatenate %118, %119 in 1 : vector<16x63xf32>, vector<16x1xf32> -> vector<16x64xf32>
    %c-1_i32 = arith.constant -1 : i32
    %121 = vector.broadcast %c-1_i32 : i32 to vector<1x64xi32>
    %122 = arith.cmpi sge, %71, %121 : vector<1x64xi32>
    %c7_i32 = arith.constant 7 : i32
    %123 = vector.broadcast %c7_i32 : i32 to vector<1x64xi32>
    %124 = arith.cmpi slt, %71, %123 : vector<1x64xi32>
    %125 = arith.andi %122, %124 : vector<1x64xi1>
    %cst_93 = arith.constant 0.000000e+00 : f32
    %126 = vector.shape_cast %125 : vector<1x64xi1> to vector<1x64xi1>
    %127 = vector.broadcast %126 : vector<1x64xi1> to vector<16x64xi1>
    %128 = vector.broadcast %cst_93 : f32 to vector<16x64xf32>
    %129 = arith.select %127, %120, %128 : vector<16x64xi1>, vector<16x64xf32>
    %130 = arith.truncf %129 : vector<16x64xf32> to vector<16x64xbf16>
    %c80 = arith.constant 80 : index
    %c0_94 = arith.constant 0 : index
    %131 = vector.load %arg11[%c80, %c0_94] : memref<112x64xbf16, #tpu.memory_space<vmem>>, vector<16x64xbf16>
    tpu.vector_store %arg11[%c80, %c0_94], %130 {strides = array<i32>} : memref<112x64xbf16, #tpu.memory_space<vmem>>, vector<16x64xbf16>,
    %132 = vector.extract_strided_slice %54 {offsets = [0, 1], sizes = [16, 63], strides = [1, 1]} : vector<16x64xf32> to vector<16x63xf32>
    %cst_95 = arith.constant 0.000000e+00 : f32
    %133 = vector.broadcast %cst_95 : f32 to vector<16x1xf32>
    %134 = tpu.concatenate %132, %133 in 1 : vector<16x63xf32>, vector<16x1xf32> -> vector<16x64xf32>
    %c-1_i32_96 = arith.constant -1 : i32
    %135 = vector.broadcast %c-1_i32_96 : i32 to vector<1x64xi32>
    %136 = arith.cmpi sge, %71, %135 : vector<1x64xi32>
    %c7_i32_97 = arith.constant 7 : i32
    %137 = vector.broadcast %c7_i32_97 : i32 to vector<1x64xi32>
    %138 = arith.cmpi slt, %71, %137 : vector<1x64xi32>
    %139 = arith.andi %136, %138 : vector<1x64xi1>
    %cst_98 = arith.constant 0.000000e+00 : f32
    %140 = vector.shape_cast %139 : vector<1x64xi1> to vector<1x64xi1>
    %141 = vector.broadcast %140 : vector<1x64xi1> to vector<16x64xi1>
    %142 = vector.broadcast %cst_98 : f32 to vector<16x64xf32>
    %143 = arith.select %141, %134, %142 : vector<16x64xi1>, vector<16x64xf32>
    %144 = arith.truncf %143 : vector<16x64xf32> to vector<16x64xbf16>
    %c96 = arith.constant 96 : index
    %c0_99 = arith.constant 0 : index
    %145 = vector.load %arg11[%c96, %c0_99] : memref<112x64xbf16, #tpu.memory_space<vmem>>, vector<16x64xbf16>
    tpu.vector_store %arg11[%c96, %c0_99], %144 {strides = array<i32>} : memref<112x64xbf16, #tpu.memory_space<vmem>>, vector<16x64xbf16>,
    %c0_100 = arith.constant 0 : index
    %c0_101 = arith.constant 0 : index
    %146 = vector.load %arg7[%c0_100, %c0_101] : memref<4x112xbf16, #tpu.memory_space<vmem>>, vector<4x112xbf16>
    %c0_102 = arith.constant 0 : index
    %c0_103 = arith.constant 0 : index
    %147 = vector.load %arg11[%c0_102, %c0_103] : memref<112x64xbf16, #tpu.memory_space<vmem>>, vector<112x64xbf16>
    %cst_104 = arith.constant dense<0.000000e+00> : vector<4x64xf32>
    %148 = tpu.matmul %146, %147, %cst_104 {dimension_numbers = #tpu.dot_dimension_numbers<[1], [0], [0], [1], [0, 0, 1, 1], [], []>} : vector<4x112xbf16>, vector<112x64xbf16>, vector<4x64xf32> -> vector<4x64xf32>
    %c0_105 = arith.constant 0 : index
    %c0_106 = arith.constant 0 : index
    %149 = vector.load %arg8[%c0_105, %c0_106] : memref<4x1xf32, #tpu.memory_space<vmem>>, vector<4x1xf32>
    %150 = vector.broadcast %149 : vector<4x1xf32> to vector<4x64xf32>
    %151 = arith.addf %148, %150 : vector<4x64xf32>
    %cst_107 = arith.constant 0.000000e+00 : f32
    %152 = vector.broadcast %cst_107 : f32 to vector<4x64xf32>
    %153 = arith.cmpf oge, %151, %152 : vector<4x64xf32>
    %cst_108 = arith.constant 0.229166672 : f32
    %154 = vector.broadcast %cst_108 : f32 to vector<4x64xf32>
    %155 = arith.mulf %151, %154 : vector<4x64xf32>
    %156 = arith.select %153, %151, %155 : vector<4x64xi1>, vector<4x64xf32>
    %c0_109 = arith.constant 0 : index
    %c0_110 = arith.constant 0 : index
    %c0_111 = arith.constant 0 : index
    %157 = vector.load %arg9[%c0_109, %c0_110, %c0_111] : memref<1x4x64xf32, #tpu.memory_space<vmem>>, vector<1x4x64xf32>
    %158 = vector.shape_cast %157 : vector<1x4x64xf32> to vector<4x64xf32>
    %159 = vector.shape_cast %156 : vector<4x64xf32> to vector<1x4x64xf32>
    tpu.vector_store %arg9[%c0_109, %c0_110, %c0_111], %159 {strides = array<i32>} : memref<1x4x64xf32, #tpu.memory_space<vmem>>, vector<1x4x64xf32>,
    return
  }
  func.func @transform_0(%arg0: i32) -> (i32, i32, i32) {
    %c0_i32 = arith.constant 0 : i32
    %c0_i32_0 = arith.constant 0 : i32
    %c0_i32_1 = arith.constant 0 : i32
    return %arg0, %c0_i32, %c0_i32_0 : i32, i32, i32
  }
  func.func @transform_1(%arg0: i32) -> (i32, i32, i32) {
    %c0_i32 = arith.constant 0 : i32
    %c0_i32_0 = arith.constant 0 : i32
    %c0_i32_1 = arith.constant 0 : i32
    return %arg0, %c0_i32, %c0_i32_0 : i32, i32, i32
  }
  func.func @transform_2(%arg0: i32) -> (i32, i32, i32) {
    %c0_i32 = arith.constant 0 : i32
    %c0_i32_0 = arith.constant 0 : i32
    %c0_i32_1 = arith.constant 0 : i32
    return %arg0, %c0_i32, %c0_i32_0 : i32, i32, i32
  }
  func.func @transform_3(%arg0: i32) -> (i32, i32, i32) {
    %c0_i32 = arith.constant 0 : i32
    %c0_i32_0 = arith.constant 0 : i32
    %c0_i32_1 = arith.constant 0 : i32
    return %arg0, %c0_i32, %c0_i32_0 : i32, i32, i32
  }
  func.func @transform_4(%arg0: i32) -> (i32, i32) {
    %c0_i32 = arith.constant 0 : i32
    %c0_i32_0 = arith.constant 0 : i32
    %c0_i32_1 = arith.constant 0 : i32
    return %c0_i32, %c0_i32_0 : i32, i32
  }
  func.func @transform_5(%arg0: i32) -> (i32, i32) {
    %c0_i32 = arith.constant 0 : i32
    %c0_i32_0 = arith.constant 0 : i32
    %c0_i32_1 = arith.constant 0 : i32
    return %c0_i32, %c0_i32_0 : i32, i32
  }
  func.func @transform_6(%arg0: i32) -> (i32, i32) {
    %c0_i32 = arith.constant 0 : i32
    %c0_i32_0 = arith.constant 0 : i32
    %c0_i32_1 = arith.constant 0 : i32
    return %c0_i32, %c0_i32_0 : i32, i32
  }
  func.func @transform_7(%arg0: i32) -> (i32, i32) {
    %c0_i32 = arith.constant 0 : i32
    %c0_i32_0 = arith.constant 0 : i32
    %c0_i32_1 = arith.constant 0 : i32
    return %c0_i32, %c0_i32_0 : i32, i32
  }
  func.func @transform_8(%arg0: i32) -> (i32, i32, i32) {
    %c0_i32 = arith.constant 0 : i32
    %c0_i32_0 = arith.constant 0 : i32
    %c0_i32_1 = arith.constant 0 : i32
    return %arg0, %c0_i32, %c0_i32_0 : i32, i32, i32
  }
}

</mosaic_0001>

<bundles_post_ra>
// kernel: split_conv_forward.2
= control target key start
LH: loop header
LB: loop body
LE: loop exit
PB: predicated region body
PF: predicated region fallthrough
CT: control target
= control target key end

     0   :  { %s971_s27 = smov 0   ;;  %s1085_s0 = inlined_call_operand.vmem [shape: bf16[2,8,88], index: 0, kind: input, shape index: {}]   ;;  %s1086_s1 = inlined_call_operand.vmem [shape: bf16[2,8,88], index: 1, kind: input, shape index: {}]   ;;  %s1087_s2 = inlined_call_operand.vmem [shape: bf16[2,8,88], index: 2, kind: input, shape index: {}]   ;;  %s1088_s3 = inlined_call_operand.vmem [shape: bf16[2,8,88], index: 3, kind: input, shape index: {}]   ;;  %s1089_s4 = inlined_call_operand.vmem [shape: bf16[16,56], index: 4, kind: input, shape index: {}]   ;;  %s1090_s5 = inlined_call_operand.vmem [shape: f32[16,1], index: 5, kind: input, shape index: {}]   ;;  %s1091_s6 = inlined_call_operand.vmem [shape: bf16[4,112], index: 6, kind: input, shape index: {}]   ;;  %s1092_s7 = inlined_call_operand.vmem [shape: f32[4,1], index: 7, kind: input, shape index: {}]   ;;  %s1093_s8 = inlined_call_operand.vmem [shape: f32[2,4,64], index: 8, kind: output, shape index: {}]  }
   0x1 LB: > { %s786_s28 = sadd.s32 4294967295, %s909_s27   ;;  %p790_p0 = scmp.ge.s32.totalorder %s909_s27, 1  ;;  %s909_s27 = sphi %s971_s27, %s18_s27  }
   0x2   : > { %p288_p1 = scmp.lt.s32.totalorder %s909_s27, 3 }
   0x4   : > { %p289_p2 = pnand %p790_p0, %p288_p1 }
   0x5   : > { %p332_p3 = scmp.lt.s32.totalorder (!%p289_p2), %s786_s28, 1  ;;  %v911_v2 = vmov (!%p289_p2), 0.0   ;;  %s912_s20 = smov (!%p289_p2), 64   ;;  %vm354_vm0 = vcmask (!%p289_p2), 519168   ;;  %vm917_vm1 = vmmov (!%p289_p2), 0   ;;  %v440_v15 = vld [vmem:[%s1090_s5] sm:$0xff] (!%p289_p2)  ;;  %v533_v51 = vlaneseq (!%p289_p2) }
   0x6   : > { %292 = sbr.rel (%p289_p2) target bundleno = 760 (0x2f8), region = 52  ;;  %818 = vmatprep.subr.bf16.mxu0 (!%p289_p2), %v911_v2  ;;  %830 = vmatprep.subr.bf16.mxu1 (!%p289_p2), %v911_v2  ;;  %s913_s21 = smov (!%p289_p2), 120   ;;  %v441_v16 = vld [vmem:[%s1090_s5 + $0x8] sm:$0xff] (!%p289_p2)  ;;  %v920_v17 = vmov (!%p289_p2), 0   ;;  %vm361_vm2 = vcmask (!%p289_p2), 1043968   ;;  %vm482_vm3 = vcmask (!%p289_p2), 1043456  }
   0x7   : > { %s914_s22 = smov (!%p289_p2), 56   ;;  %s915_s23 = smov (!%p289_p2), 112   ;;  %826 = vmatprep.mubr.msk.bf16.mxu0 (!%p289_p2), %vm917_vm1, %v911_v2  ;;  %844 = vmatprep.mubr.msk.bf16.mxu1 (!%p289_p2), %vm917_vm1, %v911_v2  ;;  %v902_v35 = vld [vmem:[%s1089_s4] sm:$0xff] (!%p289_p2)   ;;  %vm478_vm4 = vcmask (!%p289_p2), 457728   ;;  %vm566_vm7 = vcmask (!%p289_p2), 523264   ;;  %v534_v52 = vand.u32 (!%p289_p2), 127, %v533_v51 }
   0x8   : > { %s916_s24 = smov (!%p289_p2), 48   ;;  %s918_s25 = smov (!%p289_p2), 104   ;;  %871 = vset.pattern.permute.xlu0 (!%p289_p2), %v920_v17  ;;  %872 = vset.pattern.permute.xlu1 (!%p289_p2), %v920_v17  ;;  %v643_v50 = vld [vmem:[%s1092_s7] sm:$0xf] (!%p289_p2)  ;;  %vm574_vm8 = vcmask (!%p289_p2), 7168   ;;  %vm555_vm10 = vcmask (!%p289_p2), 15360  }
   0x9   : > { %s919_s26 = smov (!%p289_p2), 40   ;;  %s922_s14 = smov (!%p289_p2), 66   ;;  %v539_v53 = vand.u32 (!%p289_p2), 7, %v534_v52  ;;  %vm611_vm12 = vcmask (!%p289_p2), 515072   ;;  %vm649_vm14 = vcmask (!%p289_p2), 916480  }
   0xa   : > { %s923_s15 = smov (!%p289_p2), 65   ;;  %s925_s17 = smov (!%p289_p2), 63  }
   0xb   : > { %vm577_vm9 = vcmp.ge.s32.totalorder (!%p289_p2), %v539_v53, 1  ;;  %vm558_vm11 = vcmp.ge.s32.totalorder (!%p289_p2), %v539_v53, 2  ;;  %vm615_vm13 = vcmp.lt.s32.totalorder (!%p289_p2), %v539_v53, 7 }
   0xd   : > { %s1095_s28 = smov (!%p332_p3, %s786_s28), 1 }
   0xe   : > { %s979_s29 = sshll.u32 %s1095_s28, 2 }
   0xf   : > { %s985_s10 = scalar_lea.vmem %s1086_s1, %s979_s29  ;;  %s991_s13 = scalar_lea.vmem %s1085_s0, %s979_s29 }
  0x10   : > { %v356_v0 = vld [vmem:[%s985_s10] sm:$0xf]  ;;  %s347_s16 = scalar_lea.vmem %s1088_s3, %s979_s29  ;;  %s343_s19 = scalar_lea.vmem %s1087_s2, %s979_s29 }
  0x11   : > { %v371_v1 = vld [vmem:[%s991_s13] sm:$0xf]  ;;  %358 = vrot.lane.b32.xlu0 %v356_v0, %s912_s20 }
  0x12   : > { %373 = vrot.lane.b32.xlu1 %v371_v1, %s913_s21  ;;  %v365_v3 = vld [vmem:[%s347_s16] sm:$0xf] }
  0x13   : > { %v383_v4 = vld [vmem:[%s343_s19] sm:$0xf] }
  0x14   : > { %v353_v5 = vld [vmem:[%s991_s13] sm:$0xf] }
  0x15   : > { %v363_v6 = vld [vmem:[%s343_s19] sm:$0xf]  ;;  %367 = vrot.lane.b32.xlu0 %v365_v3, %s912_s20  ;;  %355 = vst.msk [vmem:[#allocation2] sm:$0xf] %vm354_vm0, %v353_v5 }
  0x16   : > { %385 = vrot.lane.b32.xlu1 %v383_v4, %s913_s21  ;;  %364 = vst.msk [vmem:[#allocation2 + $0x4] sm:$0xf] %vm354_vm0, %v363_v6  ;;  %v377_v7 = vld [vmem:[%s985_s10] sm:$0xf] }
  0x17   : > { %v389_v8 = vld [vmem:[%s347_s16] sm:$0xf] }
  0x18   : > { %v395_v9 = vld [vmem:[%s991_s13] sm:$0xf] }
  0x19   : > { %379 = vrot.lane.b32.xlu0 %v377_v7, %s914_s22  ;;  %v407_v10 = vld [vmem:[%s343_s19] sm:$0xf] }
  0x1a   : > { %391 = vrot.lane.b32.xlu1 %v389_v8, %s914_s22  ;;  %v401_v11 = vld [vmem:[%s985_s10] sm:$0xf] }
  0x1b   : > { %v413_v12 = vld [vmem:[%s347_s16] sm:$0xf]  ;;  %s924_s16 = smov 127  }
  0x1c   : > { %v419_v13 = vld [vmem:[%s991_s13] sm:$0xf]  ;;  %s921_s13 = smov 1  }
  0x1d   : > { %397 = vrot.lane.b32.xlu0 %v395_v9, %s915_s23  ;;  %v425_v14 = vld [vmem:[%s985_s10] sm:$0xf] }
  0x1e   : > { %409 = vrot.lane.b32.xlu1 %v407_v10, %s915_s23 }
  0x21   : > { %403 = vrot.lane.b32.xlu0 %v401_v11, %s916_s24 }
  0x22   : > { %415 = vrot.lane.b32.xlu1 %v413_v12, %s916_s24  ;;  %s351_s24 = scalar_lea.vmem %s1093_s8, %s979_s29 }
  0x25   : > { %421 = vrot.lane.b32.xlu0 %v419_v13, %s918_s25 }
  0x26   : > { %427 = vrot.lane.b32.xlu1 %v425_v14, %s919_s26 }
  0x29   : > { %444 = vperm.xlu0 %871, %v440_v15  }
  0x2a   : > { %449 = vperm.xlu1 %872, %v441_v16  }
  0x83   : > { %v359_v18 = vpop.permute.xlu0 %358 }
  0x84   : > { %v374_v19 = vpop.permute.xlu1 %373  ;;  %362 = vst.msk [vmem:[#allocation2] sm:$0xf] %vm361_vm2, %v359_v18 }
  0x85   : > { %376 = vst.msk [vmem:[#allocation2 + $0x8] sm:$0xf] %vm354_vm0, %v374_v19 }
  0x87   : > { %v368_v20 = vpop.permute.xlu0 %367 }
  0x88   : > { %v386_v21 = vpop.permute.xlu1 %385  ;;  %370 = vst.msk [vmem:[#allocation2 + $0x4] sm:$0xf] %vm361_vm2, %v368_v20 }
  0x89   : > { %388 = vst.msk [vmem:[#allocation2 + $0xc] sm:$0xf] %vm354_vm0, %v386_v21 }
  0x8b   : > { %v380_v22 = vpop.permute.xlu0 %379 }
  0x8c   : > { %v392_v23 = vpop.permute.xlu1 %391  ;;  %382 = vst.msk [vmem:[#allocation2 + $0x8] sm:$0xf] %vm361_vm2, %v380_v22 }
  0x8d   : > { %394 = vst.msk [vmem:[#allocation2 + $0xc] sm:$0xf] %vm361_vm2, %v392_v23 }
  0x8f   : > { %v398_v24 = vpop.permute.xlu0 %397  ;;  %v898_v26 = vld [vmem:[#allocation2] sm:$0xff]  }
  0x90   : > { %v410_v25 = vpop.permute.xlu1 %409  ;;  %400 = vst.msk [vmem:[#allocation2 + $0x10] sm:$0xf] %vm354_vm0, %v398_v24  ;;  %819 = vmatpush3.bf16.msra.mxu0 %v898_v26 }
  0x91   : > { %412 = vst.msk [vmem:[#allocation2 + $0x14] sm:$0xf] %vm354_vm0, %v410_v25  ;;  %820 = vmatprep.subr.bf16.mxu0 %v911_v2 }
  0x93   : > { %v404_v27 = vpop.permute.xlu0 %403 }
  0x94   : > { %v416_v28 = vpop.permute.xlu1 %415  ;;  %v899_v29 = vld [vmem:[#allocation2 + $0x8] sm:$0xff]   ;;  %406 = vst.msk [vmem:[#allocation2 + $0x10] sm:$0xf] %vm361_vm2, %v404_v27 }
  0x95   : > { %418 = vst.msk [vmem:[#allocation2 + $0x14] sm:$0xf] %vm361_vm2, %v416_v28  ;;  %821 = vmatpush3.bf16.msra.mxu0 %v899_v29 }
  0x96   : > { %822 = vmatprep.subr.bf16.mxu0 %v911_v2 }
  0x97   : > { %v422_v30 = vpop.permute.xlu0 %421 }
  0x98   : > { %v428_v31 = vpop.permute.xlu1 %427  ;;  %424 = vst.msk [vmem:[#allocation2 + $0x18] sm:$0xf] %vm354_vm0, %v422_v30 }
  0x99   : > { %430 = vst.msk [vmem:[#allocation2 + $0x18] sm:$0xf] %vm361_vm2, %v428_v31 }
  0x9c   : > { %v900_v32 = vld [vmem:[#allocation2 + $0x10] sm:$0xff]  }
  0x9d   : > { %823 = vmatpush3.bf16.msra.mxu0 %v900_v32 }
  0x9e   : > { %824 = vmatprep.subr.bf16.mxu0 %v911_v2 }
  0xa0   : > { %v901_v33 = vld [vmem:[#allocation2 + $0x18] ss:$0 sps:$4 sm:$0xff]  }
  0xa1   : > { %v484_v34 = vsel %vm482_vm3, %v901_v33, 0 }
  0xa2   : > { %825 = vmatpush3.bf16.msra.mxu0 %v484_v34 }
  0xa5   : > { %827 = vmatmul.mubr.msk.bf16.vlgmr.msra.gmra.mrb[0].mxu0 %vm478_vm4, %v902_v35 }
  0xa8   : > { %v445_v36 = vpop.permute.xlu0 %444 }
  0xa9   : > { %v450_v38 = vpop.permute.xlu1 %449 }
 0x178   : > { %v520_v37 = vpop.f32.mrb[0].mxu0 }
 0x179   : > { %v521_v39 = vadd.f32 %v520_v37, %v445_v36  ;;  %v828_v40 = vpop.f32.mrb[1].mxu0 }
 0x17a   : > { %v523_v41 = vpop.f32.mrb[2].mxu0 }
 0x17b   : > { %v529_v42 = vmul.f32 0.22916667, %v521_v39  ;;  %v524_v43 = vadd.f32 %v523_v41, %v450_v38  ;;  %v829_v44 = vpop.f32.mrb[3].mxu0  ;;  %vm527_vm5 = vcmp.ge.f32.partialorder %v521_v39, 0.0 }
 0x17d   : > { %vm528_vm6 = vcmp.ge.f32.partialorder %v524_v43, 0.0  ;;  %v530_v45 = vmul.f32 0.22916667, %v524_v43  ;;  %v531_v46 = vsel %vm527_vm5, %v521_v39, %v529_v42  ;;  %v635_v39 = vld [vmem:[%s1091_s6] sm:$0x3] }
 0x17f   : > { %v532_v47 = vsel %vm528_vm6, %v524_v43, %v530_v45 }
 0x180   : > { %v878_v48 = vpack.i.bf16 %v532_v47, %v531_v46  ;;  %v598_v49 = vpack.c.bf16 %v532_v47, %v531_v46 }
 0x182   : > { %879 = vrot.lane.b32.xlu0 %v878_v48, %s921_s13  ;;  %874 = vrot.lane.b32.xlu1 %v878_v48, %s922_s14  ;;  %599 = vst.msk [vmem:[#allocation3 + $0x18] sm:$0xff] %vm566_vm7, %v598_v49 }
 0x186   : > { %884 = vrot.lane.b32.xlu1 %v878_v48, %s923_s15  ;;  %601 = vrot.lane.b32.xlu0 %v598_v49, %s912_s20 }
 0x189   : > { %v639_v35 = vld [vmem:[#allocation3 + $0x18] sm:$0xff] }
 0x18a   : > { %889 = vrot.lane.b32.xlu1 %v878_v48, %s924_s16  ;;  %894 = vrot.lane.b32.xlu0 %v878_v48, %s925_s17 }
 0x18e   : > { %646 = vperm.xlu1 %872, %v643_v50  }
 0x1f4   : > { %v880_v54 = vpop.permute.xlu0 %879  ;;  %v875_v55 = vpop.permute.xlu1 %874 }
 0x1f5   : > { %v882_v56 = vunpack.i.h.bf16 %v880_v54  ;;  %v881_v57 = vunpack.i.l.bf16 %v880_v54  ;;  %v877_v58 = vunpack.i.h.bf16 %v875_v55  ;;  %v876_v59 = vunpack.i.l.bf16 %v875_v55 }
 0x1f7   : > { %v576_v60 = vsel %vm574_vm8, 0.0, %v882_v56  ;;  %v575_v61 = vsel %vm574_vm8, 0.0, %v881_v57  ;;  %v557_v62 = vsel %vm555_vm10, 0.0, %v877_v58  ;;  %v556_v63 = vsel %vm555_vm10, 0.0, %v876_v59 }
 0x1f8   : > { %v583_v0 = vsel %vm577_vm9, %v576_v60, 0.0  ;;  %v582_v1 = vsel %vm577_vm9, %v575_v61, 0.0  ;;  %v564_v3 = vsel %vm558_vm11, %v557_v62, 0.0  ;;  %v563_v4 = vsel %vm558_vm11, %v556_v63, 0.0  ;;  %v885_v5 = vpop.permute.xlu1 %884  ;;  %v602_v6 = vpop.permute.xlu0 %601 }
 0x1f9   : > { %v584_v7 = vpack.c.bf16 %v583_v0, %v582_v1  ;;  %v565_v8 = vpack.c.bf16 %v564_v3, %v563_v4  ;;  %v887_v9 = vunpack.i.h.bf16 %v885_v5  ;;  %v886_v10 = vunpack.i.l.bf16 %v885_v5  ;;  %604 = vst.msk [vmem:[#allocation3 + $0x20] sm:$0xff] %vm566_vm7, %v602_v6 }
 0x1fb   : > { %585 = vst.msk [vmem:[#allocation3 + $0x8] sm:$0xff] %vm566_vm7, %v584_v7  ;;  %567 = vst.msk [vmem:[#allocation3] sm:$0xff] %vm566_vm7, %v565_v8  ;;  %v593_v11 = vsel %vm574_vm8, 0.0, %v887_v9  ;;  %v592_v12 = vsel %vm574_vm8, 0.0, %v886_v10 }
 0x1fc   : > { %v595_v13 = vsel %vm577_vm9, %v593_v11, 0.0  ;;  %v594_v14 = vsel %vm577_vm9, %v592_v12, 0.0  ;;  %v890_v15 = vpop.permute.xlu1 %889  ;;  %v895_v16 = vpop.permute.xlu0 %894 }
 0x1fd   : > { %v596_v17 = vpack.c.bf16 %v595_v13, %v594_v14  ;;  %v892_v18 = vunpack.i.h.bf16 %v890_v15  ;;  %v891_v19 = vunpack.i.l.bf16 %v890_v15  ;;  %v897_v20 = vunpack.i.h.bf16 %v895_v16 }
 0x1fe   : > { %v896_v21 = vunpack.i.l.bf16 %v895_v16 }
 0x1ff   : > { %597 = vst.msk [vmem:[#allocation3 + $0x10] sm:$0xff] %vm566_vm7, %v596_v17  ;;  %v613_v22 = vsel %vm611_vm12, %v892_v18, 0.0  ;;  %v612_v23 = vsel %vm611_vm12, %v891_v19, 0.0  ;;  %v630_v24 = vsel %vm611_vm12, %v897_v20, 0.0 }
 0x200   : > { %v620_v25 = vsel %vm615_vm13, %v613_v22, 0.0  ;;  %v619_v26 = vsel %vm615_vm13, %v612_v23, 0.0  ;;  %v632_v27 = vsel %vm615_vm13, %v630_v24, 0.0  ;;  %v629_v28 = vsel %vm611_vm12, %v896_v21, 0.0  ;;  %v640_v36 = vld [vmem:[#allocation3 + $0x20] sm:$0xff] }
 0x201   : > { %v621_v29 = vpack.c.bf16 %v620_v25, %v619_v26  ;;  %v631_v30 = vsel %vm615_vm13, %v629_v28, 0.0 }
 0x202   : > { %v633_v31 = vpack.c.bf16 %v632_v27, %v631_v30  ;;  %v636_v32 = vld [vmem:[#allocation3] sm:$0xff]  ;;  %v637_v33 = vld [vmem:[#allocation3 + $0x8] sm:$0xff] }
 0x203   : > { %622 = vst.msk [vmem:[#allocation3 + $0x28] sm:$0xff] %vm566_vm7, %v621_v29  ;;  %831 = vmatpush3.bf16.msra.mxu1 %v636_v32 }
 0x204   : > { %634 = vst.msk [vmem:[#allocation3 + $0x30] sm:$0xff] %vm566_vm7, %v633_v31  ;;  %832 = vmatprep.subr.bf16.mxu1 %v911_v2 }
 0x206   : > { %v638_v34 = vld [vmem:[#allocation3 + $0x10] sm:$0xff] }
 0x207   : > { %833 = vmatpush3.bf16.msra.mxu1 %v637_v33 }
 0x208   : > { %834 = vmatprep.subr.bf16.mxu1 %v911_v2 }
 0x20a   : > { %v641_v37 = vld [vmem:[#allocation3 + $0x28] sm:$0xff] }
 0x20b   : > { %835 = vmatpush3.bf16.msra.mxu1 %v638_v34  ;;  %v642_v38 = vld [vmem:[#allocation3 + $0x30] sm:$0xff] }
 0x20c   : > { %836 = vmatprep.subr.bf16.mxu1 %v911_v2 }
 0x20d   : > { %v647_v40 = vpop.permute.xlu1 %646 }
 0x20f   : > { %837 = vmatpush3.bf16.msra.mxu1 %v639_v35 }
 0x210   : > { %838 = vmatprep.subr.bf16.mxu1 %v911_v2 }
 0x213   : > { %839 = vmatpush3.bf16.msra.mxu1 %v640_v36 }
 0x214   : > { %840 = vmatprep.subr.bf16.mxu1 %v911_v2 }
 0x217   : > { %841 = vmatpush3.bf16.msra.mxu1 %v641_v37 }
 0x218   : > { %842 = vmatprep.subr.bf16.mxu1 %v911_v2 }
 0x21b   : > { %843 = vmatpush3.bf16.msra.mxu1 %v642_v38 }
 0x21e   : > { %845 = vmatmul.mubr.msk.bf16.vlgmr.msra.gmra.mrb[0].mxu1 %vm649_vm14, %v635_v39 }
 0x2f1   : > { %v687_v41 = vpop.f32.mrb[0].mxu1 }
 0x2f2   : > { %v688_v42 = vadd.f32 %v687_v41, %v647_v40  ;;  %v846_v43 = vpop.f32.mrb[1].mxu1 }
 0x2f3   : > { %v690_v44 = vpop.f32.mrb[2].mxu1 }
 0x2f4   : > { %vm693_vm15 = vcmp.ge.f32.partialorder %v688_v42, 0.0  ;;  %v694_v45 = vmul.f32 0.22916667, %v688_v42  ;;  %v847_v2 = vpop.f32.mrb[3].mxu1 }
 0x2f6   : > { %v695_v46 = vsel %vm693_vm15, %v688_v42, %v694_v45 }
 0x2f7   : > { %696 = vst.msk [vmem:[%s351_s24] sm:$0xf] %vm354_vm0, %v695_v46 }
 0x2f8 PF: > { %s18_s27 = sadd.s32 1, %s909_s27  }
 0x2f9   : > { %p15_p4 = scmp.ge.s32.totalorder %s18_s27, 4  }
 0x2fb   :  { %17 = sbr.rel (!%p15_p4) target bundleno = 1 (0x1), region = 91 }

</bundles_post_ra>
